<compile_context>
chip_gen: v6e
topology: v6e:2x2x1
jax: 0.10.0
libtpu: 0.0.40
codegen_flags: <defaults>
</compile_context>

<pallas_src>
import functools

import jax
import jax.numpy as jnp
from jax.experimental import pallas as pl
from jax.experimental.pallas import tpu as pltpu

_LANE = 128


# ----------------------------------------------------------------------------
# helpers
# ----------------------------------------------------------------------------
def _round_up(v, m):
    return ((v + m - 1) // m) * m


def _pick_tile(dim, align, cap):
    """Return (tile, padded_dim): tile multiple of `align`, <= cap (or the full
    aligned dim when it fits under cap); padded_dim is a multiple of tile."""
    d = _round_up(dim, align)
    cap = max(align, (cap // align) * align)
    if d <= cap:
        return d, d
    best_t, best_pad = align, None
    for t in range(cap, 0, -align):
        pad = _round_up(dim, t) - dim
        if best_pad is None or pad < best_pad:
            best_t, best_pad = t, pad
    return best_t, _round_up(dim, best_t)


def _largest_aligned_divisor(total, align, cap):
    """Largest t <= cap that divides `total` and is a multiple of `align`.
    `total` must be a multiple of `align`."""
    cap = min(cap, total)
    t = max(align, (cap // align) * align)
    while t > align:
        if total % t == 0:
            return t
        t -= align
    return align


def _pad2d(a, rows, cols):
    pr, pc = rows - a.shape[0], cols - a.shape[1]
    if pr == 0 and pc == 0:
        return a
    return jnp.pad(a, ((0, pr), (0, pc)))


def _physical_vmem_bytes():
    cap = 64 * 1024 * 1024  # conservative default (v7x per-TensorCore)
    try:
        info = pltpu.get_tpu_info()
        cap = int(getattr(info, "vmem_capacity_bytes", cap) or cap)
    except Exception:
        pass
    return cap


def _vmem_tile_budget():
    # headroom for compiler-internal scratch / semaphores / pipeline buffers
    return int(_physical_vmem_bytes() * 0.55)


def _mosaic_params(needed_bytes, dims):
    limit = int(min(_physical_vmem_bytes(),
                    max(needed_bytes + (8 << 20), 32 << 20)))
    return pltpu.CompilerParams(dimension_semantics=dims,
                                vmem_limit_bytes=limit)


# ----------------------------------------------------------------------------
# Kernel 1: y = x @ W (+ bias) (+ fused BatchNorm1d epilogue when tm == M)
# ----------------------------------------------------------------------------
def _linear_kernel(x_ref, w_ref, *rest, has_bias, fuse_bn, eps, compute_dtype,
                   use_scratch):
    if use_scratch:
        o_ref, acc_ref = rest[-2], rest[-1]
        params = rest[:-2]
    else:                      # f32 output: accumulate directly in o_ref
        o_ref = rest[-1]
        acc_ref = o_ref
        params = rest[:-1]

    idx = 0
    b_ref = g_ref = beta_ref = None
    if has_bias:
        b_ref = params[idx]
        idx += 1
    if fuse_bn:
        g_ref, beta_ref = params[idx], params[idx + 1]

    k = pl.program_id(2)

    @pl.when(k == 0)
    def _init():
        if has_bias:
            acc_ref[...] = jnp.broadcast_to(
                b_ref[...].astype(jnp.float32), acc_ref.shape)
        else:
            acc_ref[...] = jnp.zeros_like(acc_ref)

    x = x_ref[...]
    if compute_dtype is not None and x.dtype != compute_dtype:
        x = x.astype(compute_dtype)     # in-kernel cast: x read once from HBM as-is
    acc_ref[...] += jnp.dot(x, w_ref[...], preferred_element_type=jnp.float32)

    if fuse_bn or use_scratch:
        @pl.when(k == pl.num_programs(2) - 1)
        def _epilogue():
            if fuse_bn:
                # The whole batch lives in this tile (tm == M): exact batch stats.
                out = acc_ref[...]
                mean = jnp.mean(out, axis=0, keepdims=True)
                var = jnp.mean((out - mean) ** 2, axis=0, keepdims=True)  # biased
                scale = g_ref[...].astype(jnp.float32) * jax.lax.rsqrt(var + eps)
                shift = beta_ref[...].astype(jnp.float32) - mean * scale
                o_ref[...] = (out * scale + shift).astype(o_ref.dtype)
            else:
                o_ref[...] = acc_ref[...].astype(o_ref.dtype)


def linear_pallas(x, w_p, *, n_out, bias_p=None, gamma_p=None, beta_p=None,
                  eps=1e-5, fuse_bn=False, compute_dtype=jnp.bfloat16):
    """x: (M, K).  w_p: (Kp, Np) pre-transposed/padded/cast weight.
    bias_p/gamma_p/beta_p: (1, Np) padded row vectors.  Returns (M, n_out)."""
    M, K = x.shape
    Kp, Np = w_p.shape
    out_dtype = x.dtype
    has_bias = bias_p is not None
    use_scratch = out_dtype != jnp.float32

    x_bytes = jnp.dtype(x.dtype).itemsize
    w_bytes = jnp.dtype(w_p.dtype).itemsize
    out_bytes = jnp.dtype(out_dtype).itemsize
    m_align = max(8, 32 // x_bytes)
    budget = _vmem_tile_budget()

    def tile_bytes(tm_, tk_, tn_):
        b = (2 * tm_ * tk_ * x_bytes + 2 * tk_ * tn_ * w_bytes
             + 2 * tm_ * tn_ * out_bytes)
        if use_scratch:
            b += tm_ * tn_ * 4
        return b

    # Large MXU-sized tiles; tn/tk constrained to divisors of the pre-padded
    # weight so the weight never needs re-padding per call.
    tk = _largest_aligned_divisor(Kp, _LANE, 1024)
    tn = _largest_aligned_divisor(Np, _LANE, 2048)
    if fuse_bn:
        tm, Mp = M, M          # whole batch per tile => exact batch statistics
    else:
        tm, Mp = _pick_tile(M, m_align, 512)

    # Shrink to the generation-aware VMEM budget: tk first (doesn't change HBM
    # traffic), then tn, then tm.
    while tile_bytes(tm, tk, tn) > budget and tk > _LANE:
        tk = _largest_aligned_divisor(Kp, _LANE, tk - _LANE)
    while tile_bytes(tm, tk, tn) > budget and tn > _LANE:
        tn = _largest_aligned_divisor(Np, _LANE, tn - _LANE)
    while (not fuse_bn) and tile_bytes(tm, tk, tn) > budget and tm > m_align:
        tm, Mp = _pick_tile(M, m_align, max(m_align, tm // 2))

    # Keep >=2 blocks on a parallel axis so both v7x TensorCores get work
    # (one harmless extra grid step on single-core v5e/v6e).
    if Mp // tm == 1 and Np // tn == 1 and Np % (2 * _LANE) == 0:
        tn = Np // 2

    # TODO(synk): for very large ragged activations, handle the partial edge
    # tiles with masked stores instead of this pad + slice (extra HBM passes).
    x_p = _pad2d(x, Mp, Kp)

    grid = (Mp // tm, Np // tn, Kp // tk)
    args = [x_p, w_p]
    in_specs = [
        pl.BlockSpec((tm, tk), lambda i, j, k: (i, k)),
        pl.BlockSpec((tk, tn), lambda i, j, k: (k, j)),
    ]
    if has_bias:
        args.append(bias_p)
        in_specs.append(pl.BlockSpec((1, tn), lambda i, j, k: (0, j)))
    if fuse_bn:
        args += [gamma_p, beta_p]
        in_specs += [pl.BlockSpec((1, tn), lambda i, j, k: (0, j)),
                     pl.BlockSpec((1, tn), lambda i, j, k: (0, j))]

    scratch = [pltpu.VMEM((tm, tn), jnp.float32)] if use_scratch else []

    cost = pl.CostEstimate(
        flops=2 * Mp * Np * Kp,
        transcendentals=Np if fuse_bn else 0,
        bytes_accessed=(Mp * Kp * x_bytes * (Np // tn)
                        + Kp * Np * w_bytes * (Mp // tm)
                        + Mp * Np * out_bytes))

    kernel = functools.partial(_linear_kernel, has_bias=has_bias,
                               fuse_bn=fuse_bn, eps=eps,
                               compute_dtype=compute_dtype,
                               use_scratch=use_scratch)
    y = pl.pallas_call(
        kernel,
        out_shape=jax.ShapeDtypeStruct((Mp, Np), out_dtype),
        grid_spec=pltpu.PrefetchScalarGridSpec(
            num_scalar_prefetch=0,
            grid=grid,
            in_specs=in_specs,
            out_specs=pl.BlockSpec((tm, tn), lambda i, j, k: (i, j)),
            scratch_shapes=scratch,
        ),
        compiler_params=_mosaic_params(tile_bytes(tm, tk, tn),
                                       ("parallel", "parallel", "arbitrary")),
        cost_estimate=cost,
    )(*args)

    if (Mp, Np) != (M, n_out):
        y = y[:M, :n_out]
    return y


def _fuse_bn_feasible(M, Kp, Np, x_bytes, w_bytes, out_bytes):
    """Can the whole batch live in one (M, tn) tile (exact batch stats)?
    Checked at the minimal 128x128 weight tile against the VMEM budget."""
    tk = min(Kp, _LANE)
    tn = min(Np, _LANE)
    need = (2 * M * tk * x_bytes + 2 * tk * tn * w_bytes
            + 2 * M * tn * out_bytes + M * tn * 4)
    return need <= _vmem_tile_budget()


# ----------------------------------------------------------------------------
# Kernel 2: standalone BatchNorm1d (fallback for batches too large to fuse)
# ----------------------------------------------------------------------------
def _bn_kernel(z_ref, g_ref, b_ref, o_ref, *, eps):
    z = z_ref[...].astype(jnp.float32)
    mean = jnp.mean(z, axis=0, keepdims=True)
    var = jnp.mean((z - mean) ** 2, axis=0, keepdims=True)   # biased (train mode)
    scale = g_ref[...].astype(jnp.float32) * jax.lax.rsqrt(var + eps)
    shift = b_ref[...].astype(jnp.float32) - mean * scale
    o_ref[...] = (z * scale + shift).astype(o_ref.dtype)


def _bn_stats_kernel(z_ref, g_ref, b_ref, scale_ref, shift_ref, sum_ref, sq_ref,
                     *, eps, inv_m):
    m = pl.program_id(1)

    @pl.when(m == 0)
    def _():
        sum_ref[...] = jnp.zeros_like(sum_ref)
        sq_ref[...] = jnp.zeros_like(sq_ref)

    z = z_ref[...].astype(jnp.float32)
    sum_ref[...] += jnp.sum(z, axis=0, keepdims=True)
    sq_ref[...] += jnp.sum(z * z, axis=0, keepdims=True)

    @pl.when(m == pl.num_programs(1) - 1)
    def _():
        mean = sum_ref[...] * inv_m
        var = sq_ref[...] * inv_m - mean * mean
        scale = g_ref[...].astype(jnp.float32) * jax.lax.rsqrt(var + eps)
        scale_ref[...] = scale
        shift_ref[...] = b_ref[...].astype(jnp.float32) - mean * scale


def _bn_apply_kernel(z_ref, scale_ref, shift_ref, o_ref):
    o_ref[...] = (z_ref[...].astype(jnp.float32) * scale_ref[...]
                  + shift_ref[...]).astype(o_ref.dtype)


def batchnorm1d_pallas(z, gamma_p, beta_p, *, n_out, eps=1e-5, two_pass=None):
    """Standalone BatchNorm1d (train-mode batch stats) over z: (M, N).
    gamma_p / beta_p: (1, Np) 128-padded row vectors."""
    M, N = z.shape
    Np = gamma_p.shape[1]
    z_bytes = jnp.dtype(z.dtype).itemsize
    budget = _vmem_tile_budget()

    # Single pass keeps a whole (M, tn) column resident; fall back to the
    # two-pass (blocked stats, then normalize) path when even tn=128 blows VMEM.
    if two_pass is None:
        two_pass = 4 * M * _LANE * z_bytes > budget

    if not two_pass:
        tn_cap = max(_LANE, (budget // (4 * M * z_bytes)) // _LANE * _LANE)
        tn = _largest_aligned_divisor(Np, _LANE, min(tn_cap, 2048))
        z_p = _pad2d(z, M, Np)
        y = pl.pallas_call(
            functools.partial(_bn_kernel, eps=eps),
            out_shape=jax.ShapeDtypeStruct((M, Np), z.dtype),
            grid_spec=pltpu.PrefetchScalarGridSpec(
                num_scalar_prefetch=0,
                grid=(Np // tn,),
                in_specs=[pl.BlockSpec((M, tn), lambda j: (0, j)),
                          pl.BlockSpec((1, tn), lambda j: (0, j)),
                          pl.BlockSpec((1, tn), lambda j: (0, j))],
                out_specs=pl.BlockSpec((M, tn), lambda j: (0, j)),
            ),
            compiler_params=_mosaic_params(4 * M * tn * z_bytes, ("parallel",)),
        )(z_p, gamma_p, beta_p)
        return y[:, :n_out] if Np != n_out else y

    # ---- two-pass path: blocked sums -> (scale, shift), then normalize ----
    m_align = max(8, 32 // z_bytes)
    tm, Mp = _pick_tile(M, m_align, 512)
    tn = _largest_aligned_divisor(Np, _LANE, 512)
    z_p = _pad2d(z, Mp, Np)   # zero rows don't perturb sums (divide by true M)

    scale, shift = pl.pallas_call(
        functools.partial(_bn_stats_kernel, eps=eps, inv_m=1.0 / M),
        out_shape=(jax.ShapeDtypeStruct((1, Np), jnp.float32),
                   jax.ShapeDtypeStruct((1, Np), jnp.float32)),
        grid_spec=pltpu.PrefetchScalarGridSpec(
            num_scalar_prefetch=0,
            grid=(Np // tn, Mp // tm),
            in_specs=[pl.BlockSpec((tm, tn), lambda j, m: (m, j)),
                      pl.BlockSpec((1, tn), lambda j, m: (0, j)),
                      pl.BlockSpec((1, tn), lambda j, m: (0, j))],
            out_specs=[pl.BlockSpec((1, tn), lambda j, m: (0, j)),
                       pl.BlockSpec((1, tn), lambda j, m: (0, j))],
            scratch_shapes=[pltpu.VMEM((1, tn), jnp.float32),
                            pltpu.VMEM((1, tn), jnp.float32)],
        ),
        compiler_params=_mosaic_params(2 * tm * tn * z_bytes,
                                       ("parallel", "arbitrary")),
    )(z_p, gamma_p, beta_p)

    y = pl.pallas_call(
        _bn_apply_kernel,
        out_shape=jax.ShapeDtypeStruct((Mp, Np), z.dtype),
        grid_spec=pltpu.PrefetchScalarGridSpec(
            num_scalar_prefetch=0,
            grid=(Mp // tm, Np // tn),
            in_specs=[pl.BlockSpec((tm, tn), lambda i, j: (i, j)),
                      pl.BlockSpec((1, tn), lambda i, j: (0, j)),
                      pl.BlockSpec((1, tn), lambda i, j: (0, j))],
            out_specs=pl.BlockSpec((tm, tn), lambda i, j: (i, j)),
        ),
        compiler_params=_mosaic_params(4 * tm * tn * z_bytes,
                                       ("parallel", "parallel")),
    )(z_p, scale, shift)
    if (Mp, Np) != (M, n_out):
        y = y[:M, :n_out]
    return y


# ----------------------------------------------------------------------------
# LinearLayer wrapper (mirrors the PyTorch module's forward semantics)
# ----------------------------------------------------------------------------
class LinearLayerPallas:
    def __init__(self, in_features, out_features, use_bias=True, use_bn=False,
                 compute_dtype=jnp.bfloat16, key=None):
        if key is None:
            key = jax.random.PRNGKey(0)
        self.in_features = in_features
        self.out_features = out_features
        self.use_bias = use_bias
        self.use_bn = use_bn
        self.compute_dtype = compute_dtype
        self.eps = 1e-5

        self.Kp = _round_up(in_features, _LANE)
        self.Np = _round_up(out_features, _LANE)

        k_w, k_b = jax.random.split(key)
        bound = in_features ** -0.5
        # nn.Linear weight is (out_features, in_features).
        self.weight = jax.random.uniform(k_w, (out_features, in_features),
                                         jnp.float32, -bound, bound)
        # Weight prep hoisted out of the per-call path: transpose + pad + cast.
        w_t = _pad2d(self.weight.T, self.Kp, self.Np)          # (Kp, Np)
        if compute_dtype is not None:
            w_t = w_t.astype(compute_dtype)
        self.w_p = w_t

        self.has_linear_bias = self.use_bias and (not self.use_bn)
        if self.has_linear_bias:
            self.bias = jax.random.uniform(k_b, (1, out_features), jnp.float32,
                                           -bound, bound)
            self.b_p = _pad2d(self.bias, 1, self.Np)
        else:
            self.bias = None
            self.b_p = None

        if self.use_bn:
            self.gamma = jnp.ones((1, out_features), jnp.float32)
            self.beta = jnp.zeros((1, out_features), jnp.float32)
            self.gamma_p = _pad2d(self.gamma, 1, self.Np)
            self.beta_p = _pad2d(self.beta, 1, self.Np)
            # TODO(synk): running_mean / running_var buffer updates (eval-mode
            # statistics) are not reproduced; forward uses batch stats as in
            # PyTorch train mode.

    def set_bn_params(self, gamma, beta):
        assert self.use_bn
        self.gamma = jnp.asarray(gamma, jnp.float32).reshape(1, self.out_features)
        self.beta = jnp.asarray(beta, jnp.float32).reshape(1, self.out_features)
        self.gamma_p = _pad2d(self.gamma, 1, self.Np)
        self.beta_p = _pad2d(self.beta, 1, self.Np)

    def __call__(self, x):
        M = x.shape[0]
        xb = jnp.dtype(x.dtype).itemsize
        wb = jnp.dtype(self.w_p.dtype).itemsize
        if self.use_bn and _fuse_bn_feasible(M, self.Kp, self.Np, xb, wb, xb):
            # Fused matmul + BN epilogue: the (M, N) activation never
            # round-trips HBM; fusion limit is VMEM-budget derived.
            return linear_pallas(x, self.w_p, n_out=self.out_features,
                                 bias_p=self.b_p, gamma_p=self.gamma_p,
                                 beta_p=self.beta_p, eps=self.eps, fuse_bn=True,
                                 compute_dtype=self.compute_dtype)
        y = linear_pallas(x, self.w_p, n_out=self.out_features, bias_p=self.b_p,
                          compute_dtype=self.compute_dtype)
        if self.use_bn:
            y = batchnorm1d_pallas(y, self.gamma_p, self.beta_p,
                                   n_out=self.out_features, eps=self.eps)
        return y


if __name__ == "__main__":
    key = jax.random.PRNGKey(0)
    k_x, k_m1, k_m2, k_m3, k_x2, k_g, k_be, k_z = jax.random.split(key, 8)

    batch, in_features, out_features = 16, 128, 256
    x = jax.random.normal(k_x, (batch, in_features), jnp.float32)

    # 1) Linear + bias, default bf16 compute (f32 accumulation).
    layer = LinearLayerPallas(in_features, out_features, use_bias=True,
                              use_bn=False, key=k_m1)
    y = jax.block_until_ready(layer(x))
    y_ref = x @ layer.weight.T + layer.bias
    assert y.shape == (batch, out_features)
    assert jnp.allclose(y, y_ref, atol=5e-2, rtol=5e-2)

    # 2) Linear + bias, exact f32 compute path.
    layer_f32 = LinearLayerPallas(in_features, out_features, use_bias=True,
                                  use_bn=False, compute_dtype=None, key=k_m1)
    y32 = jax.block_until_ready(layer_f32(x))
    assert jnp.allclose(y32, x @ layer_f32.weight.T + layer_f32.bias,
                        atol=1e-4, rtol=1e-4)

    # 3) Linear (no bias) + BatchNorm1d (batch stats), fused epilogue, f32.
    layer_bn = LinearLayerPallas(in_features, out_features, use_bias=True,
                                 use_bn=True, compute_dtype=None, key=k_m2)
    layer_bn.set_bn_params(
        jax.random.uniform(k_g, (1, out_features), jnp.float32, 0.5, 1.5),
        0.1 * jax.random.normal(k_be, (1, out_features), jnp.float32))
    y_bn = jax.block_until_ready(layer_bn(x))
    z_ref = x @ layer_bn.weight.T
    mean = jnp.mean(z_ref, axis=0, keepdims=True)
    var = jnp.mean((z_ref - mean) ** 2, axis=0, keepdims=True)
    y_bn_ref = layer_bn.gamma * (z_ref - mean) / jnp.sqrt(var + 1e-5) + layer_bn.beta
    assert jnp.allclose(y_bn, y_bn_ref, atol=1e-3, rtol=1e-3)

    # 4) Non-multiple shapes exercise the pad + slice path (exact f32).
    x_odd = jax.random.normal(k_x2, (10, 100), jnp.float32)
    layer_odd = LinearLayerPallas(100, 200, use_bias=True, use_bn=False,
                                  compute_dtype=None, key=k_m3)
    y_odd = jax.block_until_ready(layer_odd(x_odd))
    y_odd_ref = x_odd @ layer_odd.weight.T + layer_odd.bias
    assert jnp.allclose(y_odd, y_odd_ref, atol=1e-4, rtol=1e-4)

    # 5) Standalone two-pass BatchNorm (the large-batch fallback), small shapes.
    z = jax.random.normal(k_z, (64, 256), jnp.float32)
    g = jnp.ones((1, 256), jnp.float32)
    b = jnp.zeros((1, 256), jnp.float32)
    y2 = jax.block_until_ready(
        batchnorm1d_pallas(z, g, b, n_out=256, eps=1e-5, two_pass=True))
    zm = jnp.mean(z, axis=0, keepdims=True)
    zv = jnp.mean((z - zm) ** 2, axis=0, keepdims=True)
    y2_ref = (z - zm) / jnp.sqrt(zv + 1e-5)
    assert jnp.allclose(y2, y2_ref, atol=1e-3, rtol=1e-3)

    print("KERNEL_OK")
</pallas_src>

<mosaic_0001>
module attributes {stable_mosaic.version = 11 : i64} {
  func.func @_linear_kernel(%arg0: i32, %arg1: i32, %arg2: i32, %arg3: memref<16x128xf32, #tpu.memory_space<vmem>>, %arg4: memref<128x128xbf16, #tpu.memory_space<vmem>>, %arg5: memref<1x128xf32, #tpu.memory_space<vmem>>, %arg6: memref<16x128xf32, #tpu.memory_space<vmem>>) attributes {dimension_semantics = [#tpu.dimension_semantics<parallel>, #tpu.dimension_semantics<parallel>, #tpu.dimension_semantics<arbitrary>], iteration_bounds = array<i64: 1, 2, 1>, scalar_prefetch = 0 : i64, scratch_operands = 0 : i64, tpu.core_type = #tpu.core_type<tc>, window_params = [{transform_indices = @transform_0, window_bounds = array<i64: 16, 128>}, {transform_indices = @transform_1, window_bounds = array<i64: 128, 128>}, {transform_indices = @transform_2, window_bounds = array<i64: 1, 128>}, {transform_indices = @transform_3, window_bounds = array<i64: 16, 128>}]} {
    %c0_i32 = arith.constant 0 : i32
    %0 = arith.cmpi eq, %arg2, %c0_i32 : i32
    %1 = arith.extui %0 : i1 to i32
    %c0_i32_0 = arith.constant 0 : i32
    %2 = arith.cmpi ne, %1, %c0_i32_0 : i32
    scf.if %2 {
      %c0_8 = arith.constant 0 : index
      %c0_9 = arith.constant 0 : index
      %10 = vector.load %arg5[%c0_8, %c0_9] : memref<1x128xf32, #tpu.memory_space<vmem>>, vector<1x128xf32>
      %11 = vector.shape_cast %10 : vector<1x128xf32> to vector<1x128xf32>
      %12 = vector.broadcast %11 : vector<1x128xf32> to vector<16x128xf32>
      %c0_10 = arith.constant 0 : index
      %c0_11 = arith.constant 0 : index
      %13 = vector.load %arg6[%c0_10, %c0_11] : memref<16x128xf32, #tpu.memory_space<vmem>>, vector<16x128xf32>
      tpu.vector_store %arg6[%c0_10, %c0_11], %12 {strides = array<i32>} : memref<16x128xf32, #tpu.memory_space<vmem>>, vector<16x128xf32>,
    } else {
    }
    %c0 = arith.constant 0 : index
    %c0_1 = arith.constant 0 : index
    %3 = vector.load %arg3[%c0, %c0_1] : memref<16x128xf32, #tpu.memory_space<vmem>>, vector<16x128xf32>
    %4 = arith.truncf %3 : vector<16x128xf32> to vector<16x128xbf16>
    %c0_2 = arith.constant 0 : index
    %c0_3 = arith.constant 0 : index
    %5 = vector.load %arg6[%c0_2, %c0_3] : memref<16x128xf32, #tpu.memory_space<vmem>>, vector<16x128xf32>
    %c0_4 = arith.constant 0 : index
    %c0_5 = arith.constant 0 : index
    %6 = vector.load %arg4[%c0_4, %c0_5] : memref<128x128xbf16, #tpu.memory_space<vmem>>, vector<128x128xbf16>
    %cst = arith.constant dense<0.000000e+00> : vector<16x128xf32>
    %7 = tpu.matmul %4, %6, %cst {dimension_numbers = #tpu.dot_dimension_numbers<[1], [0], [0], [1], [0, 0, 1, 1], [], []>} : vector<16x128xbf16>, vector<128x128xbf16>, vector<16x128xf32> -> vector<16x128xf32>
    %8 = arith.addf %5, %7 : vector<16x128xf32>
    %c0_6 = arith.constant 0 : index
    %c0_7 = arith.constant 0 : index
    %9 = vector.load %arg6[%c0_6, %c0_7] : memref<16x128xf32, #tpu.memory_space<vmem>>, vector<16x128xf32>
    tpu.vector_store %arg6[%c0_6, %c0_7], %8 {strides = array<i32>} : memref<16x128xf32, #tpu.memory_space<vmem>>, vector<16x128xf32>,
    return
  }
  func.func @transform_0(%arg0: i32, %arg1: i32, %arg2: i32) -> (i32, i32) {
    %c0_i32 = arith.constant 0 : i32
    return %arg0, %arg2 : i32, i32
  }
  func.func @transform_1(%arg0: i32, %arg1: i32, %arg2: i32) -> (i32, i32) {
    %c0_i32 = arith.constant 0 : i32
    return %arg2, %arg1 : i32, i32
  }
  func.func @transform_2(%arg0: i32, %arg1: i32, %arg2: i32) -> (i32, i32) {
    %c0_i32 = arith.constant 0 : i32
    %c0_i32_0 = arith.constant 0 : i32
    return %c0_i32, %arg1 : i32, i32
  }
  func.func @transform_3(%arg0: i32, %arg1: i32, %arg2: i32) -> (i32, i32) {
    %c0_i32 = arith.constant 0 : i32
    return %arg0, %arg1 : i32, i32
  }
}

</mosaic_0001>

<bundles_post_ra>
// kernel: tpu_custom_call.1
= control target key start
LH: loop header
LB: loop body
LE: loop exit
PB: predicated region body
PF: predicated region fallthrough
CT: control target
= control target key end

     0   :  { %8 = vsyncpa [#allocation3], 0  ;;  %s1013_s0 = inlined_call_operand.hbm [shape: f32[16,128], index: 0, kind: input, shape index: {}]   ;;  %s1014_s1 = inlined_call_operand.hbm [shape: bf16[128,256], index: 1, kind: input, shape index: {}]   ;;  %s1015_s2 = inlined_call_operand.vmem [shape: f32[1,256], index: 2, kind: input, shape index: {}]   ;;  %s1016_s3 = inlined_call_operand.hbm [shape: f32[16,256], index: 3, kind: output, shape index: {}]  }
   0x1   :  { %9 = vsyncpa [#allocation6], 0 }
   0x2   :  { %11 = vsyncpa [#allocation6 + $0x1], 0 }
   0x3   :  { %12 = vsyncpa [#allocation4], 0 }
   0x4   :  { %14 = vsyncpa [#allocation4 + $0x1], 0  ;;  %s829_s12 = smov 0   ;;  %s831_s13 = smov 0  }
   0x5   :  { %s833_s14 = smov 0   ;;  %s835_s15 = smov 0  }
   0x6   :  { %s837_s16 = smov 0   ;;  %s839_s17 = smov 0  }
   0x7 LB: > { %1022 = sst [smem:[#allocation11_spill]] %s795_s17  ;;  %s514_s18 = sadd.s32 4294967295, %s795_s17   ;;  %s795_s17 = sphi %s839_s17, %s20_s17   ;;  %s791_s16 = sphi %s837_s16, %s1042_s16   ;;  %s787_s15 = sphi %s835_s15, %s1041_s15   ;;  %s783_s14 = sphi %s833_s14, %s1040_s14   ;;  %s779_s13 = sphi %s831_s13, %s1039_s13   ;;  %s775_s12 = sphi %s829_s12, %s1038_s12  }
   0x8   : > { %s515_s19 = sadd.s32 4294967294, %s795_s17   ;;  %p83_p0 = scmp.ne.s32.totalorder %s783_s14, %s779_s13 }
   0x9   : > { %p84_p1 = scmp.eq.s32.totalorder %s795_s17, 0  ;;  %p89_p2 = scmp.ne.s32.totalorder %s779_s13, %s775_s12 }
   0xa   : > { %p866_p3 = scmp.eq.s32.totalorder %s514_s18, 0  ;;  %p141_p5 = scmp.eq.s32.totalorder %s514_s18, 1 }
   0xb   : > { %p870_p4 = por %p84_p1, %p83_p0  ;;  %p147_p7 = scmp.eq.s32.totalorder %s515_s19, 1 }
   0xc   : > { %p876_p6 = por %p866_p3, %p89_p2  ;;  %p880_p8 = por %p141_p5, %p83_p0 }
   0xd   : > { %p516_p9 = scmp.ge.s32.totalorder %s795_s17, 1  ;;  %p885_p10 = por %p147_p7, %p89_p2 }
   0xe   : > { %s1025_s22 = scalar_select %p876_p6, 1, 0 }
   0xf   : > { %s1026_s23 = scalar_select %p880_p8, 1, 0 }
  0x10   : > { %s1027_s24 = scalar_select %p885_p10, 1, 0 }
  0x11   : > { %p154_p11 = scmp.lt.s32.totalorder %s795_s17, 3  ;;  %s797_s26 = smov [#allocation2]  }
  0x12   : > { %1028 = sst [smem:[#allocation12_spill]] %s1027_s24  ;;  %s170_s27 = sshll.u32 %s797_s26, 4  ;;  %s171_s27 = int_to_ptr.vmem [resolvable:$true] %s170_s27 }
  0x13   : > { %p890_p12 = pnand %p516_p9, %p154_p11  ;;  %p588_p1 = scmp.lt.s32.totalorder %s795_s17, 2 }
  0x14   : > { %s35_s30 = sadd.s32 1, %s791_s16  ;;  %s668_s4 = scalar_lea.vmem %s171_s27, 256 }
  0x15   : > { %p575_p13 = pneg %p890_p12  ;;  %p906_p2 = pnand %p588_p1, %p870_p4 }
  0x16   : > { %p669_p9 = scmp.ne.s32.totalorder %s171_s27, %s668_s4  ;;  %p676_p0 = scmp.lt.s32.totalorder %s171_s27, %s171_s27 }
  0x17   : > { %p900_p5 = pnand %p575_p13, %p866_p3  ;;  %p677_p8 = scmp.lt.s32.totalorder %s668_s4, %s668_s4 }
  0x19   : > { %p659_p7 = pneg %p900_p5  ;;  %p678_p6 = por %p677_p8, %p676_p0 }
  0x1b   : > { %p671_p11 = pnand %p669_p9, %p659_p7 }
  0x1d   : > { %p672_p10 = pneg %p671_p11 }
  0x1f   : > { %p679_p13 = pnand %p678_p6, %p672_p10 }
  0x21   : > { %682 = shalt.err (!%p679_p13)
}
  0x22   : > { %s798_s5 = smov 128   ;;  %s799_s6 = smov 8  }
  0x23   : > { %578 = dma.hbm_to_vmem [thread:$0]  (!%p900_p5), %s1013_s0, 256, %s171_s27, [#allocation3], %s798_s5, %s798_s5, %s799_s6  }
  0x24   : > { %p37_p4 = scmp.ge.s32.totalorder %s35_s30, 2  ;;  %s76_s9 = sadd.s32 1, %s783_s14 }
  0x25   : > { %s184_s10 = sand.u32 1, %s783_s14   ;;  %s520_s19 = sshll.u32 %s791_s16, 6 }
  0x26   : > { %s1044_s30 = smov (%p37_p4, %s35_s30), 0  ;;  %s519_s11 = sshll.u32 %s184_s10, 6 }
  0x27   : > { %s72_s18 = ssub.s32 %s791_s16, %s1044_s30  ;;  %s196_s28 = scalar_lea.hbm %s1014_s1, %s520_s19 }
  0x28   : > { %p74_p6 = scmp.eq.s32.totalorder %s72_s18, 0  ;;  %s188_s4 = scalar_lea.vmem [#allocation5], %s519_s11 }
  0x29   : > { %s197_s17 = sshll.u32 %s188_s4, 4  ;;  %s185_s27 = scalar_lea.sflag [#allocation6], %s184_s10  ;;  %s198_s17 = int_to_ptr.vmem [resolvable:$true] %s197_s17 }
  0x2a   : > { %s931_s24 = scalar_select %p74_p6, %s783_s14, %s76_s9  }
  0x2b   : > { %p685_p8 = pneg %p906_p2  ;;  %s696_s6 = scalar_lea.vmem %s198_s17, 1024 }
  0x2c   : > { %p697_p10 = scmp.ne.s32.totalorder %s198_s17, %s696_s6  ;;  %s800_s7 = smov [#allocation5]  }
  0x2d   : > { %s701_s8 = sshll.u32 %s800_s7, 4  ;;  %s702_s8 = int_to_ptr.vmem [resolvable:$false] %s701_s8 }
  0x2e   : > { %p699_p0 = pnand %p697_p10, %p685_p8  ;;  %s703_s18 = scalar_lea.vmem %s702_s8, 2048 }
  0x2f   : > { %p704_p5 = scmp.lt.s32.totalorder %s198_s17, %s702_s8  ;;  %p705_p7 = scmp.lt.s32.totalorder %s703_s18, %s696_s6 }
  0x30   : > { %p700_p1 = pneg %p699_p0 }
  0x31   : > { %p706_p9 = por %p705_p7, %p704_p5 }
  0x33   : > { %p707_p11 = pnand %p706_p9, %p700_p1 }
  0x35   : > { %710 = shalt.err (!%p707_p11)
}
  0x36   : > { %s801_s11 = smov 64   ;;  %s802_s9 = smov 4  }
  0x37   : > { %582 = dma.hbm_to_vmem [thread:$0]  (!%p906_p2), %s196_s28, 1024, %s198_s17, %s185_s27, %s798_s5, %s801_s11, %s802_s9  }
  0x38   : > { %215 = sbr.rel (%p890_p12) target bundleno = 313 (0x139), region = 32 }
  0x3d   : > { %762 = dma.done.wait (%p866_p3), [#allocation3], 256  }
  0x3e   : > { %764 = vsyncadd (%p866_p3), [#allocation3], 4294967040  ;;  %s945_s10 = sand.u32 1, %s779_s13   ;;  %p1032_p13 = scmp.ne.s32.totalorder %s1025_s22, 0 }
  0x3f   : > { %s523_s19 = sshll.u32 %s945_s10, 6  ;;  %s222_s21 = scalar_lea.sflag [#allocation6], %s945_s10 }
  0x40   : > { %s225_s29 = scalar_lea.vmem [#allocation5], %s523_s19 }
  0x41   : > { %766 = dma.done.wait (%p1032_p13), %s222_s21, 1024  }
  0x42   : > { %768 = vsyncadd (%p1032_p13), %s222_s21, 4294966272  ;;  %v803_v0 = vmov 0.0   ;;  %vm804_vm0 = vmmov 0   ;;  %v649_v1 = vld [vmem:[%s225_s29 + $0x38] sm:$0xff]   ;;  %v650_v2 = vld [vmem:[%s225_s29 + $0x30] sm:$0xff]   ;;  %p253_p3 = scmp.lt.s32.totalorder %s787_s15, 1 }
  0x43   : > { %547 = vmatprep.subr.bf16.mxu0 %v803_v0  ;;  %563 = vmatprep.mubr.msk.bf16.mxu0 %vm804_vm0, %v803_v0  ;;  %v651_v3 = vld [vmem:[%s225_s29 + $0x28] sm:$0xff]   ;;  %v652_v4 = vld [vmem:[%s225_s29 + $0x20] sm:$0xff]   ;;  %v653_v5 = vld [vmem:[%s225_s29 + $0x18] sm:$0xff]   ;;  %s524_s5 = sshll.u32 %s945_s10, 4  ;;  %s535_s26 = sshll.u32 %s787_s15, 7 }
  0x44   : > { %548 = vmatpush3.bf16.msra.mxu0 %v649_v1  ;;  %v654_v6 = vld [vmem:[%s225_s29 + $0x10] sm:$0xff]   ;;  %v655_v7 = vld [vmem:[%s225_s29 + $0x8] sm:$0xff]   ;;  %v656_v8 = vld [vmem:[%s225_s29] sm:$0xff]   ;;  %s254_s17 = scalar_select %p253_p3, %s787_s15, 1 }
  0x45   : > { %549 = vmatprep.subr.bf16.mxu0 %v803_v0  ;;  %v271_v9 = vld [vmem:[#allocation2] sm:$0xff]  ;;  %v272_v10 = vld [vmem:[#allocation2 + $0x8] sm:$0xff]  ;;  %s250_s28 = scalar_lea.vmem [#allocation7], %s524_s5  ;;  %s963_s7 = scalar_lea.hbm %s1016_s3, %s535_s26 }
  0x46   : > { %v273_v11 = vpack.c.bf16 %v272_v10, %v271_v9  ;;  %s255_s25 = scalar_lea.vmem %s1015_s2, %s254_s17  ;;  %s401_s4 = sshll.u32 %s250_s28, 4  ;;  %s965_s4 = int_to_ptr.vmem [resolvable:$true] %s401_s4 }
  0x47   : > { %v525_v12 = vld [vmem:[%s255_s25] ss:$0 sm:$0xff]  ;;  %s386_s15 = scalar_lea.sflag [#allocation4], %s945_s10  ;;  %s711_s8 = scalar_lea.vmem %s965_s4, 256 }
  0x48   : > { %550 = vmatpush3.bf16.msra.mxu0 %v650_v2  ;;  %p712_p12 = scmp.ne.s32.totalorder %s965_s4, %s711_s8  ;;  %p1033_p2 = scmp.ne.s32.totalorder %s1026_s23, 0 }
  0x49   : > { %551 = vmatprep.subr.bf16.mxu0 %v803_v0  ;;  %s805_s18 = smov [#allocation7]  }
  0x4a   : > { %p713_p4 = pnand %p712_p12, %p1033_p2  ;;  %s715_s11 = sshll.u32 %s805_s18, 4  ;;  %s716_s11 = int_to_ptr.vmem [resolvable:$false] %s715_s11 }
  0x4b   : > { %s717_s9 = scalar_lea.vmem %s716_s11, 512  ;;  %p718_p8 = scmp.lt.s32.totalorder %s965_s4, %s716_s11 }
  0x4c   : > { %552 = vmatpush3.bf16.msra.mxu0 %v651_v3  ;;  %p714_p6 = pneg %p713_p4  ;;  %p719_p10 = scmp.lt.s32.totalorder %s717_s9, %s711_s8 }
  0x4d   : > { %553 = vmatprep.subr.bf16.mxu0 %v803_v0 }
  0x4e   : > { %p720_p0 = por %p719_p10, %p718_p8 }
  0x50   : > { %554 = vmatpush3.bf16.msra.mxu0 %v652_v4  ;;  %p721_p1 = pnand %p720_p0, %p714_p6 }
  0x51   : > { %555 = vmatprep.subr.bf16.mxu0 %v803_v0 }
  0x54   : > { %556 = vmatpush3.bf16.msra.mxu0 %v653_v5 }
  0x55   : > { %557 = vmatprep.subr.bf16.mxu0 %v803_v0 }
  0x58   : > { %558 = vmatpush3.bf16.msra.mxu0 %v654_v6 }
  0x59   : > { %559 = vmatprep.subr.bf16.mxu0 %v803_v0 }
  0x5c   : > { %560 = vmatpush3.bf16.msra.mxu0 %v655_v7 }
  0x5d   : > { %561 = vmatprep.subr.bf16.mxu0 %v803_v0 }
  0x60   : > { %562 = vmatpush3.bf16.msra.mxu0 %v656_v8 }
  0x63   : > { %564 = vmatmul.mubr.bf16.vlgmr.msra.gmra.mxu0 %v273_v11 }
 0x123   : > { %v374_v13 = vpop.f32.mrf.mxu0 }
 0x124   : > { %v381_v14 = vadd.f32 %v525_v12, %v374_v13 }
 0x125   : > { %v565_v15 = vpop.f32.mrf.mxu0 }
 0x126   : > { %383 = vst [vmem:[%s250_s28] sm:$0xff] %v381_v14 }
 0x127   : > { %v377_v16 = vpop.f32.mrf.mxu0 }
 0x128   : > { %v382_v17 = vadd.f32 %v525_v12, %v377_v16 }
 0x129   : > { %v566_v18 = vpop.f32.mrf.mxu0 }
 0x12a   : > { %384 = vst [vmem:[%s250_s28 + $0x8] sm:$0xff] %v382_v17 }
 0x12b   : > { %724 = shalt.err (!%p721_p1)
}
 0x12c   : > { %s725_s19 = scalar_lea.hbm %s963_s7, 256  ;;  %s729_s17 = scalar_lea.hbm %s1016_s3, 512 }
 0x12d   : > { %p726_p5 = scmp.ne.s32.totalorder %s963_s7, %s725_s19  ;;  %p730_p11 = scmp.lt.s32.totalorder %s963_s7, %s1016_s3 }
 0x12e   : > { %p731_p13 = scmp.lt.s32.totalorder %s729_s17, %s725_s19 }
 0x12f   : > { %p727_p7 = pnand %p726_p5, %p1033_p2 }
 0x130   : > { %p732_p3 = por %p731_p13, %p730_p11 }
 0x131   : > { %p728_p9 = pneg %p727_p7 }
 0x133   : > { %p733_p12 = pnand %p732_p3, %p728_p9 }
 0x135   : > { %736 = shalt.err (!%p733_p12)
}
 0x136   : > { %s806_s25 = smov 128   ;;  %s807_s5 = smov 256  }
 0x137   : > { %s808_s26 = smov 8  }
 0x138   : > { %573 = dma.vmem_to_hbm [thread:$0]  (%p1033_p2), %s965_s4, 256, %s963_s7, %s386_s15, %s806_s25, %s807_s5, %s808_s26  }
 0x139 PF: > { %s1034_s28 = sld [smem:[#allocation12_spill]]  ;;  %s416_s6 = sand.u32 1, %s775_s12  }
 0x13a   : > { %s1035_s27 = sld [smem:[#allocation11_spill]]  ;;  %s417_s8 = scalar_lea.sflag [#allocation4], %s416_s6 }
 0x13f   : > { %p1036_p4 = scmp.ne.s32.totalorder %s1034_s28, 0 }
 0x140   : > { %p1037_p6 = scmp.ge.s32.totalorder %s1035_s27, 2 }
 0x142   : > { %p584_p8 = pnand %p1037_p6, %p1036_p4 }
 0x144   : > { %p585_p10 = pneg %p584_p8 }
 0x146   : > { %770 = dma.done.wait (%p585_p10), %s417_s8, 256  }
 0x147   : > { %772 = vsyncadd (%p585_p10), %s417_s8, 4294967040  ;;  %s20_s17 = sadd.s32 1, %s1035_s27   ;;  %s1038_s12 = smov %s779_s13 }
 0x148   : > { %p17_p0 = scmp.ge.s32.totalorder %s20_s17, 4   ;;  %s1039_s13 = smov %s783_s14 }
 0x149   : > { %s1040_s14 = smov %s931_s24  ;;  %s1041_s15 = smov %s791_s16 }
 0x14a   : > { %s1042_s16 = smov %s1044_s30  ;;  %19 = sbr.rel (!%p17_p0) target bundleno = 7 (0x7), region = 90 }
 0x14f   :  { %422 = vsyncpa [#allocation3], 1 }
 0x150   :  { %424 = vsyncpa [#allocation3 + $0x1], 1 }
 0x151   :  { %425 = vsyncpa [#allocation6], 1 }
 0x152   :  { %427 = vsyncpa [#allocation6 + $0x1], 1 }
 0x153   :  { %428 = vsyncpa [#allocation4], 1 }
 0x154   :  { %430 = vsyncpa [#allocation4 + $0x1], 1 }

</bundles_post_ra>
